<compile_context>
chip_gen: v7x
topology: tpu7x:2x2x1
jax: 0.10.0
libtpu: 0.0.40
codegen_flags: <defaults>
</compile_context>

<pallas_src>
import functools

import jax
import jax.numpy as jnp
from jax.experimental import pallas as pl
from jax.experimental.pallas import tpu as pltpu

ACTION_DIM = 3
STATE_DIM = 16   # synthetic: len(env.get_state()) -> number of data columns
H1 = 64
H2 = 32
HEAD_DIM = ACTION_DIM + 1   # fused pi (3) + v (1)

# Batch tile: multiple of 8 (f32 sublane); 128+ amortizes the ~0.35us/step
# grid overhead. Working set (2 x TB x 16 f32 in, 2 x TB x 4 f32 out, weights
# ~6 KiB, intermediates TB x 96 f32) is tiny vs the 32 MiB scoped VMEM limit,
# so the same tile is safe on v5e/v6e (128 MiB) and v7x (64 MiB).
DEFAULT_TB = 128


def actor_critic_kernel(x_ref, w1_ref, b1_ref, w2_ref, b2_ref,
                        wh_ref, bh_ref, out_ref):
    # One batch tile per grid step; weights/biases are grid-invariant blocks.
    x = x_ref[...]

    # fc1 + relu
    h1 = jnp.dot(x, w1_ref[...], preferred_element_type=jnp.float32) + b1_ref[...]
    h1 = jnp.maximum(h1, 0.0)

    # fc2 + relu
    h2 = jnp.dot(h1, w2_ref[...], preferred_element_type=jnp.float32) + b2_ref[...]
    h2 = jnp.maximum(h2, 0.0)

    # fused policy + value heads -> single [TB, 4] store
    out = jnp.dot(h2, wh_ref[...], preferred_element_type=jnp.float32) + bh_ref[...]
    out_ref[...] = out.astype(out_ref.dtype)


@functools.partial(jax.jit, static_argnames=("tb",))
def actor_critic_forward(state, params, *, tb=DEFAULT_TB):
    """state: [B, STATE_DIM] f32. Returns (pi [B, ACTION_DIM], v [B, 1])."""
    B, state_dim = state.shape
    w1, b1, w2, b2, wpi, bpi, wv, bv = params

    # Fuse the two heads into one matmul / one output.
    wh = jnp.concatenate([wpi, wv], axis=1)   # (H2, HEAD_DIM)
    bh = jnp.concatenate([bpi, bv], axis=1)   # (1,  HEAD_DIM)
    head_dim = wh.shape[1]

    # Tile the batch; pad up to a multiple of the tile if needed.
    tb = min(tb, B)
    pad = (-B) % tb
    state_p = jnp.pad(state, ((0, pad), (0, 0))) if pad else state
    Bp = B + pad
    grid = (Bp // tb,)

    state_spec = pl.BlockSpec((tb, state_dim), lambda i: (i, 0))
    out_spec = pl.BlockSpec((tb, head_dim), lambda i: (i, 0))

    def resident(arr):
        # Full-array block with constant index_map: fetched once, stays in VMEM.
        return pl.BlockSpec(arr.shape, lambda i: (0, 0))

    flops = 2 * Bp * (state_dim * H1 + H1 * H2 + H2 * head_dim)
    weight_bytes = 4 * (w1.size + b1.size + w2.size + b2.size + wh.size + bh.size)
    bytes_accessed = 4 * Bp * (state_dim + head_dim) + weight_bytes

    fused = pl.pallas_call(
        actor_critic_kernel,
        out_shape=jax.ShapeDtypeStruct((Bp, head_dim), jnp.float32),
        grid=grid,
        in_specs=[
            state_spec,
            resident(w1), resident(b1),
            resident(w2), resident(b2),
            resident(wh), resident(bh),
        ],
        out_specs=out_spec,
        compiler_params=pltpu.CompilerParams(
            dimension_semantics=("parallel",)),
        cost_estimate=pl.CostEstimate(
            flops=flops, transcendentals=0, bytes_accessed=bytes_accessed),
    )(state_p, w1, b1, w2, b2, wh, bh)

    fused = fused[:B]
    pi = fused[:, :ACTION_DIM]
    v = fused[:, ACTION_DIM:]
    return pi, v


def init_params(key, state_dim=STATE_DIM, action_dim=ACTION_DIM):
    """Deterministic init mimicking nn.Linear default: U(-1/sqrt(fan_in), 1/sqrt(fan_in)).
    Weights stored as (in, out) == PyTorch weight.T."""
    ks = jax.random.split(key, 8)

    def linear(kw, kb, fan_in, fan_out):
        bound = 1.0 / jnp.sqrt(float(fan_in))
        w = jax.random.uniform(kw, (fan_in, fan_out), jnp.float32, -bound, bound)
        b = jax.random.uniform(kb, (1, fan_out), jnp.float32, -bound, bound)
        return w, b

    w1, b1 = linear(ks[0], ks[1], state_dim, H1)
    w2, b2 = linear(ks[2], ks[3], H1, H2)
    wpi, bpi = linear(ks[4], ks[5], H2, action_dim)
    wv, bv = linear(ks[6], ks[7], H2, 1)
    return (w1, b1, w2, b2, wpi, bpi, wv, bv)


def reference_forward(state, params):
    w1, b1, w2, b2, wpi, bpi, wv, bv = params
    h1 = jnp.maximum(state @ w1 + b1, 0.0)
    h2 = jnp.maximum(h1 @ w2 + b2, 0.0)
    return h2 @ wpi + bpi, h2 @ wv + bv


if __name__ == "__main__":
    key = jax.random.PRNGKey(0)
    k_params, k_state = jax.random.split(key)

    params = init_params(k_params)

    # Rollout-sized batch so the grid actually pipelines (2 tiles of 128),
    # plus a tiny ragged batch to exercise padding.
    for B in (256, 8):
        state = jax.random.normal(k_state, (B, STATE_DIM), dtype=jnp.float32)

        pi, v = actor_critic_forward(state, params)
        pi, v = jax.block_until_ready((pi, v))

        pi_ref, v_ref = reference_forward(state, params)
        assert pi.shape == (B, ACTION_DIM) and v.shape == (B, 1)
        assert jnp.allclose(pi, pi_ref, atol=1e-5, rtol=1e-5)
        assert jnp.allclose(v, v_ref, atol=1e-5, rtol=1e-5)

    print("KERNEL_OK")
</pallas_src>

<mosaic_0001>
module attributes {stable_mosaic.version = 11 : i64} {
  func.func @actor_critic_kernel(%arg0: i32, %arg1: memref<128x16xf32, #tpu.memory_space<vmem>>, %arg2: memref<16x64xf32, #tpu.memory_space<vmem>>, %arg3: memref<1x64xf32, #tpu.memory_space<vmem>>, %arg4: memref<64x32xf32, #tpu.memory_space<vmem>>, %arg5: memref<1x32xf32, #tpu.memory_space<vmem>>, %arg6: memref<32x4xf32, #tpu.memory_space<vmem>>, %arg7: memref<1x4xf32, #tpu.memory_space<vmem>>, %arg8: memref<128x4xf32, #tpu.memory_space<vmem>>) attributes {dimension_semantics = [#tpu.dimension_semantics<parallel>], iteration_bounds = array<i64: 2>, scalar_prefetch = 0 : i64, scratch_operands = 0 : i64, tpu.core_type = #tpu.core_type<tc>, window_params = [{transform_indices = @transform_0, window_bounds = array<i64: 128, 16>}, {pipeline_mode = #tpu.pipeline_mode<synchronous>, transform_indices = @transform_1, window_bounds = array<i64: 16, 64>}, {pipeline_mode = #tpu.pipeline_mode<synchronous>, transform_indices = @transform_2, window_bounds = array<i64: 1, 64>}, {pipeline_mode = #tpu.pipeline_mode<synchronous>, transform_indices = @transform_3, window_bounds = array<i64: 64, 32>}, {pipeline_mode = #tpu.pipeline_mode<synchronous>, transform_indices = @transform_4, window_bounds = array<i64: 1, 32>}, {pipeline_mode = #tpu.pipeline_mode<synchronous>, transform_indices = @transform_5, window_bounds = array<i64: 32, 4>}, {pipeline_mode = #tpu.pipeline_mode<synchronous>, transform_indices = @transform_6, window_bounds = array<i64: 1, 4>}, {transform_indices = @transform_7, window_bounds = array<i64: 128, 4>}]} {
    %c0 = arith.constant 0 : index
    %c0_0 = arith.constant 0 : index
    %0 = vector.load %arg1[%c0, %c0_0] : memref<128x16xf32, #tpu.memory_space<vmem>>, vector<128x16xf32>
    %c0_1 = arith.constant 0 : index
    %c0_2 = arith.constant 0 : index
    %1 = vector.load %arg2[%c0_1, %c0_2] : memref<16x64xf32, #tpu.memory_space<vmem>>, vector<16x64xf32>
    %cst = arith.constant dense<0.000000e+00> : vector<128x64xf32>
    %2 = tpu.matmul %0, %1, %cst {dimension_numbers = #tpu.dot_dimension_numbers<[1], [0], [0], [1], [0, 0, 1, 1], [], []>} : vector<128x16xf32>, vector<16x64xf32>, vector<128x64xf32> -> vector<128x64xf32>
    %c0_3 = arith.constant 0 : index
    %c0_4 = arith.constant 0 : index
    %3 = vector.load %arg3[%c0_3, %c0_4] : memref<1x64xf32, #tpu.memory_space<vmem>>, vector<1x64xf32>
    %4 = vector.broadcast %3 : vector<1x64xf32> to vector<128x64xf32>
    %5 = arith.addf %2, %4 : vector<128x64xf32>
    %cst_5 = arith.constant 0.000000e+00 : f32
    %6 = vector.broadcast %cst_5 : f32 to vector<128x64xf32>
    %7 = arith.maximumf %5, %6 : vector<128x64xf32>
    %c0_6 = arith.constant 0 : index
    %c0_7 = arith.constant 0 : index
    %8 = vector.load %arg4[%c0_6, %c0_7] : memref<64x32xf32, #tpu.memory_space<vmem>>, vector<64x32xf32>
    %cst_8 = arith.constant dense<0.000000e+00> : vector<128x32xf32>
    %9 = tpu.matmul %7, %8, %cst_8 {dimension_numbers = #tpu.dot_dimension_numbers<[1], [0], [0], [1], [0, 0, 1, 1], [], []>} : vector<128x64xf32>, vector<64x32xf32>, vector<128x32xf32> -> vector<128x32xf32>
    %c0_9 = arith.constant 0 : index
    %c0_10 = arith.constant 0 : index
    %10 = vector.load %arg5[%c0_9, %c0_10] : memref<1x32xf32, #tpu.memory_space<vmem>>, vector<1x32xf32>
    %11 = vector.broadcast %10 : vector<1x32xf32> to vector<128x32xf32>
    %12 = arith.addf %9, %11 : vector<128x32xf32>
    %cst_11 = arith.constant 0.000000e+00 : f32
    %13 = vector.broadcast %cst_11 : f32 to vector<128x32xf32>
    %14 = arith.maximumf %12, %13 : vector<128x32xf32>
    %c0_12 = arith.constant 0 : index
    %c0_13 = arith.constant 0 : index
    %15 = vector.load %arg6[%c0_12, %c0_13] : memref<32x4xf32, #tpu.memory_space<vmem>>, vector<32x4xf32>
    %cst_14 = arith.constant dense<0.000000e+00> : vector<128x4xf32>
    %16 = tpu.matmul %14, %15, %cst_14 {dimension_numbers = #tpu.dot_dimension_numbers<[1], [0], [0], [1], [0, 0, 1, 1], [], []>} : vector<128x32xf32>, vector<32x4xf32>, vector<128x4xf32> -> vector<128x4xf32>
    %c0_15 = arith.constant 0 : index
    %c0_16 = arith.constant 0 : index
    %17 = vector.load %arg7[%c0_15, %c0_16] : memref<1x4xf32, #tpu.memory_space<vmem>>, vector<1x4xf32>
    %18 = vector.broadcast %17 : vector<1x4xf32> to vector<128x4xf32>
    %19 = arith.addf %16, %18 : vector<128x4xf32>
    %c0_17 = arith.constant 0 : index
    %c0_18 = arith.constant 0 : index
    %20 = vector.load %arg8[%c0_17, %c0_18] : memref<128x4xf32, #tpu.memory_space<vmem>>, vector<128x4xf32>
    tpu.vector_store %arg8[%c0_17, %c0_18], %19 {strides = array<i32>} : memref<128x4xf32, #tpu.memory_space<vmem>>, vector<128x4xf32>,
    return
  }
  func.func @transform_0(%arg0: i32) -> (i32, i32) {
    %c0_i32 = arith.constant 0 : i32
    %c0_i32_0 = arith.constant 0 : i32
    return %arg0, %c0_i32 : i32, i32
  }
  func.func @transform_1(%arg0: i32) -> (i32, i32) {
    %c0_i32 = arith.constant 0 : i32
    %c0_i32_0 = arith.constant 0 : i32
    %c0_i32_1 = arith.constant 0 : i32
    return %c0_i32, %c0_i32_0 : i32, i32
  }
  func.func @transform_2(%arg0: i32) -> (i32, i32) {
    %c0_i32 = arith.constant 0 : i32
    %c0_i32_0 = arith.constant 0 : i32
    %c0_i32_1 = arith.constant 0 : i32
    return %c0_i32, %c0_i32_0 : i32, i32
  }
  func.func @transform_3(%arg0: i32) -> (i32, i32) {
    %c0_i32 = arith.constant 0 : i32
    %c0_i32_0 = arith.constant 0 : i32
    %c0_i32_1 = arith.constant 0 : i32
    return %c0_i32, %c0_i32_0 : i32, i32
  }
  func.func @transform_4(%arg0: i32) -> (i32, i32) {
    %c0_i32 = arith.constant 0 : i32
    %c0_i32_0 = arith.constant 0 : i32
    %c0_i32_1 = arith.constant 0 : i32
    return %c0_i32, %c0_i32_0 : i32, i32
  }
  func.func @transform_5(%arg0: i32) -> (i32, i32) {
    %c0_i32 = arith.constant 0 : i32
    %c0_i32_0 = arith.constant 0 : i32
    %c0_i32_1 = arith.constant 0 : i32
    return %c0_i32, %c0_i32_0 : i32, i32
  }
  func.func @transform_6(%arg0: i32) -> (i32, i32) {
    %c0_i32 = arith.constant 0 : i32
    %c0_i32_0 = arith.constant 0 : i32
    %c0_i32_1 = arith.constant 0 : i32
    return %c0_i32, %c0_i32_0 : i32, i32
  }
  func.func @transform_7(%arg0: i32) -> (i32, i32) {
    %c0_i32 = arith.constant 0 : i32
    %c0_i32_0 = arith.constant 0 : i32
    return %arg0, %c0_i32 : i32, i32
  }
}

</mosaic_0001>

<bundles_post_ra>
// kernel: actor_critic_forward.1
= control target key start
LH: loop header
LB: loop body
LE: loop exit
PB: predicated region body
PF: predicated region fallthrough
CT: control target
= control target key end

     0   :  { %s1330_s24 = smov 0   ;;  %s1505_s0 = inlined_call_operand.vmem [shape: f32[256,16], index: 0, kind: input, shape index: {}]   ;;  %s1506_s1 = inlined_call_operand.vmem [shape: f32[16,64], index: 1, kind: input, shape index: {}]   ;;  %s1507_s2 = inlined_call_operand.vmem [shape: f32[1,64], index: 2, kind: input, shape index: {}]   ;;  %s1508_s3 = inlined_call_operand.vmem [shape: f32[64,32], index: 3, kind: input, shape index: {}]   ;;  %s1509_s4 = inlined_call_operand.vmem [shape: f32[1,32], index: 4, kind: input, shape index: {}]   ;;  %s1510_s5 = inlined_call_operand.vmem [shape: f32[32,4], index: 5, kind: input, shape index: {}]   ;;  %s1511_s6 = inlined_call_operand.vmem [shape: f32[1,4], index: 6, kind: input, shape index: {}]   ;;  %s1512_s7 = inlined_call_operand.vmem [shape: f32[256,4], index: 7, kind: output, shape index: {}]  }
   0x1 LB: > { %s1020_s25 = sadd.s32 4294967295, %s1288_s24   ;;  %p1024_p0 = scmp.ge.s32.totalorder %s1288_s24, 1  ;;  %s1288_s24 = sphi %s1330_s24, %s17_s24  }
   0x2   : > { %p238_p1 = scmp.lt.s32.totalorder %s1288_s24, 3 }
   0x4   : > { %p239_p2 = pnand %p1024_p0, %p238_p1 }
   0x5   : > { %v298_v0 = vld [vmem:[%s1506_s1] sm:$0xff] (!%p239_p2)  ;;  %v299_v1 = vld [vmem:[%s1506_s1 + $0x8] sm:$0xff] (!%p239_p2)  ;;  %s1025_s30 = sshll.u32 (!%p239_p2), %s1020_s25, 4  ;;  %vm307_vm0 = vcmask (!%p239_p2), 130048   ;;  %v519_v6 = vld [vmem:[%s1508_s3 + $0x10] sm:$0xff] (!%p239_p2)  ;;  %vm532_vm1 = vcmask (!%p239_p2), 523264  }
   0x6   : > { %242 = sbr.rel (%p239_p2) target bundleno = 698 (0x2ba), region = 48  ;;  %v517_v2 = vld [vmem:[%s1508_s3] sm:$0xff] (!%p239_p2)  ;;  %v1244_v3 = vpack.c.bf16 (!%p239_p2), %v299_v1, %v298_v0  ;;  %p271_p3 = scmp.lt.s32.totalorder (!%p239_p2), %s1025_s30, 31  ;;  %v518_v4 = vld [vmem:[%s1508_s3 + $0x8] sm:$0xff] (!%p239_p2)  ;;  %v520_v7 = vld [vmem:[%s1508_s3 + $0x18] sm:$0xff] (!%p239_p2)  ;;  %vm753_vm2 = vcmask (!%p239_p2), 261120  }
   0x7   : > { %v1248_v5 = vpack.c.bf16 (!%p239_p2), %v518_v4, %v517_v2  ;;  %v1252_v12 = vpack.c.bf16 (!%p239_p2), %v520_v7, %v519_v6  ;;  %v521_v13 = vld [vmem:[%s1508_s3 + $0x20] sm:$0xff] (!%p239_p2)  ;;  %v522_v14 = vld [vmem:[%s1508_s3 + $0x28] sm:$0xff] (!%p239_p2)  ;;  %v523_v28 = vld [vmem:[%s1508_s3 + $0x30] sm:$0xff] (!%p239_p2)  ;;  %vm947_vm3 = vcmask (!%p239_p2), 31744  }
   0x8   : > { %1245 = vmatprep.subr.bf16.mxu0 (!%p239_p2), %v1244_v3  ;;  %1272 = vmatprep.subr.bf16.mxu1 (!%p239_p2), %v1244_v3  ;;  %v1256_v21 = vpack.c.bf16 (!%p239_p2), %v522_v14, %v521_v13  ;;  %v524_v29 = vld [vmem:[%s1508_s3 + $0x38] sm:$0xff] (!%p239_p2)  ;;  %v742_v31 = vld [vmem:[%s1510_s5] sm:$0xff] (!%p239_p2)  ;;  %v743_v32 = vld [vmem:[%s1510_s5 + $0x8] sm:$0xff] (!%p239_p2) }
   0x9   : > { %1247 = vmatpush3.bf16.msra.mxu0 (!%p239_p2), %v1244_v3  ;;  %1273 = vmatpush3.bf16.msra.mxu1 (!%p239_p2), %v1244_v3  ;;  %v1260_v30 = vpack.c.bf16 (!%p239_p2), %v524_v29, %v523_v28  ;;  %v744_v33 = vld [vmem:[%s1510_s5 + $0x10] sm:$0xff] (!%p239_p2)  ;;  %v1264_v34 = vpack.c.bf16 (!%p239_p2), %v743_v32, %v742_v31  ;;  %v745_v35 = vld [vmem:[%s1510_s5 + $0x18] sm:$0xff] (!%p239_p2)  ;;  %v1029_v37 = vld [vmem:[%s1507_s2] ss:$0 sm:$0xff] (!%p239_p2) }
   0xa   : > { %1249 = vmatprep.subr.bf16.mxu1 (!%p239_p2), %v1248_v5  ;;  %v1268_v36 = vpack.c.bf16 (!%p239_p2), %v745_v35, %v744_v33 }
   0xb   : > { %1265 = vmatprep.subr.bf16.mxu0 (!%p239_p2), %v1264_v34 }
   0xd   : > { %s1514_s30 = smov (!%p271_p3, %s1025_s30), 31 }
   0xe   : > { %s1026_s12 = sshll.u32 %s1514_s30, 3 }
   0xf   : > { %s1358_s15 = scalar_lea.vmem %s1505_s0, %s1026_s12  ;;  %s1468_s25 = scalar_lea.vmem %s1512_s7, %s1026_s12 }
  0x10   : > { %v282_v8 = vld [vmem:[%s1358_s15] sm:$0xff]  ;;  %v283_v9 = vld [vmem:[%s1358_s15 + $0x8] sm:$0xff]  ;;  %v284_v10 = vld [vmem:[%s1358_s15 + $0x10] sm:$0xff] }
  0x11   : > { %1148 = vmatprep.mubr.msk.f32.mxu0 %vm307_vm0, %v282_v8  ;;  %v290_v11 = vld [vmem:[%s1358_s15 + $0x40] sm:$0xff]  ;;  %v285_v15 = vld [vmem:[%s1358_s15 + $0x18] sm:$0xff]  ;;  %v291_v16 = vld [vmem:[%s1358_s15 + $0x48] sm:$0xff] }
  0x12   : > { %1149 = vmatmul.mubr.msk.f32.vlgmr.msra.gmra.mrb[0].mxu0 %vm307_vm0, %v283_v9  ;;  %1160 = vmatprep.mubr.msk.f32.mxu1 %vm307_vm0, %v290_v11  ;;  %v292_v17 = vld [vmem:[%s1358_s15 + $0x50] sm:$0xff]  ;;  %v286_v18 = vld [vmem:[%s1358_s15 + $0x20] sm:$0xff]  ;;  %v293_v19 = vld [vmem:[%s1358_s15 + $0x58] sm:$0xff] }
  0x13   : > { %1151 = vmatprep.mubr.msk.f32.mxu0 %vm307_vm0, %v284_v10  ;;  %1161 = vmatmul.mubr.msk.f32.vlgmr.msra.gmra.mrb[0].mxu1 %vm307_vm0, %v291_v16  ;;  %v294_v20 = vld [vmem:[%s1358_s15 + $0x60] sm:$0xff]  ;;  %v287_v22 = vld [vmem:[%s1358_s15 + $0x28] sm:$0xff]  ;;  %v288_v23 = vld [vmem:[%s1358_s15 + $0x30] sm:$0xff] }
  0x14   : > { %1163 = vmatprep.mubr.msk.f32.mxu1 %vm307_vm0, %v292_v17  ;;  %1251 = vmatpush3.bf16.msra.mxu1 %v1248_v5  ;;  %v295_v24 = vld [vmem:[%s1358_s15 + $0x68] sm:$0xff]  ;;  %v296_v25 = vld [vmem:[%s1358_s15 + $0x70] sm:$0xff]  ;;  %v289_v26 = vld [vmem:[%s1358_s15 + $0x38] sm:$0xff] }
  0x15   : > { %1253 = vmatprep.subr.bf16.mxu1 %v1252_v12  ;;  %v297_v27 = vld [vmem:[%s1358_s15 + $0x78] sm:$0xff]  ;;  %1267 = vmatpush3.bf16.msra.mxu0 %v1264_v34 }
  0x16   : > { %1152 = vmatmul.mubr.msk.f32.gmra.mrb[2].mxu0 %vm307_vm0, %v285_v15  ;;  %1269 = vmatprep.subr.bf16.mxu0 %v1268_v36 }
  0x17   : > { %1154 = vmatprep.mubr.msk.f32.mxu0 %vm307_vm0, %v286_v18  ;;  %1164 = vmatmul.mubr.msk.f32.gmra.mrb[2].mxu1 %vm307_vm0, %v293_v19 }
  0x18   : > { %1166 = vmatprep.mubr.msk.f32.mxu1 %vm307_vm0, %v294_v20  ;;  %1255 = vmatpush3.bf16.msra.mxu1 %v1252_v12 }
  0x19   : > { %1257 = vmatprep.subr.bf16.mxu1 %v1256_v21  ;;  %1271 = vmatpush3.bf16.msra.mxu0 %v1268_v36 }
  0x1a   : > { %1155 = vmatmul.mubr.msk.f32.gmra.mrb[4].mxu0 %vm307_vm0, %v287_v22  ;;  %v1046_v22 = vld [vmem:[%s1509_s4] ss:$0 sm:$0xff] }
  0x1b   : > { %1157 = vmatprep.mubr.msk.f32.mxu0 %vm307_vm0, %v288_v23  ;;  %1167 = vmatmul.mubr.msk.f32.gmra.mrb[4].mxu1 %vm307_vm0, %v295_v24 }
  0x1c   : > { %1169 = vmatprep.mubr.msk.f32.mxu1 %vm307_vm0, %v296_v25  ;;  %1259 = vmatpush3.bf16.msra.mxu1 %v1256_v21 }
  0x1d   : > { %1261 = vmatprep.subr.bf16.mxu1 %v1260_v30 }
  0x1e   : > { %1158 = vmatmul.mubr.msk.f32.gmra.mrb[6].mxu0 %vm307_vm0, %v289_v26 }
  0x1f   : > { %1170 = vmatmul.mubr.msk.f32.gmra.mrb[6].mxu1 %vm307_vm0, %v297_v27 }
  0x20   : > { %1263 = vmatpush3.bf16.msra.mxu1 %v1260_v30 }
  0xe5   : > { %v1150_v38 = vpop.f32.mrb[0].mxu0 }
  0xe6   : > { %v428_v39 = vadd.f32 %v1150_v38, %v1029_v37  ;;  %v422_v40 = vpop.f32.mrb[1].mxu0  ;;  %v1162_v42 = vpop.f32.mrb[0].mxu1 }
  0xe7   : > { %v423_v41 = vadd.f32 %v1029_v37, %v422_v40  ;;  %v462_v43 = vpop.f32.mrb[1].mxu1  ;;  %v468_v9 = vadd.f32 %v1162_v42, %v1029_v37 }
  0xe8   : > { %v502_v46 = vmax.f32 %v428_v39, 0.0  ;;  %v463_v62 = vadd.f32 %v1029_v37, %v462_v43 }
  0xe9   : > { %v501_v44 = vmax.f32 %v423_v41, 0.0  ;;  %v1153_v45 = vpop.f32.mrb[2].mxu0  ;;  %v510_v12 = vmax.f32 %v468_v9, 0.0 }
  0xea   : > { %v438_v47 = vadd.f32 %v1153_v45, %v1029_v37  ;;  %v432_v48 = vpop.f32.mrb[3].mxu0  ;;  %v1165_v50 = vpop.f32.mrb[2].mxu1  ;;  %v509_v6 = vmax.f32 %v463_v62, 0.0 }
  0xeb   : > { %v433_v49 = vadd.f32 %v1029_v37, %v432_v48  ;;  %1188 = vmatprep.mubr.msk.f32.mxu1 %vm532_vm1, %v501_v44  ;;  %v472_v51 = vpop.f32.mrb[3].mxu1  ;;  %v478_v13 = vadd.f32 %v1165_v50, %v1029_v37 }
  0xec   : > { %1189 = vmatmul.mubr.msk.f32.vlgmr.msra.gmra.mrb[8].mxu1 %vm532_vm1, %v502_v46  ;;  %v504_v54 = vmax.f32 %v438_v47, 0.0  ;;  %v473_v7 = vadd.f32 %v1029_v37, %v472_v51 }
  0xed   : > { %v503_v52 = vmax.f32 %v433_v49, 0.0  ;;  %v1156_v53 = vpop.f32.mrb[4].mxu0  ;;  %v512_v16 = vmax.f32 %v478_v13, 0.0 }
  0xee   : > { %v448_v55 = vadd.f32 %v1156_v53, %v1029_v37  ;;  %v442_v56 = vpop.f32.mrb[5].mxu0  ;;  %v1168_v58 = vpop.f32.mrb[4].mxu1  ;;  %v511_v10 = vmax.f32 %v473_v7, 0.0  ;;  %v1063_v7 = vld [vmem:[%s1511_s6] ss:$0 sm:$0xff] }
  0xef   : > { %v443_v57 = vadd.f32 %v1029_v37, %v442_v56  ;;  %1191 = vmatprep.mubr.msk.f32.mxu1 %vm532_vm1, %v503_v52  ;;  %v482_v59 = vpop.f32.mrb[5].mxu1  ;;  %v488_v17 = vadd.f32 %v1168_v58, %v1029_v37 }
  0xf0   : > { %1192 = vmatmul.mubr.msk.f32.gmra.mrb[10].mxu1 %vm532_vm1, %v504_v54  ;;  %v506_v63 = vmax.f32 %v448_v55, 0.0  ;;  %v483_v11 = vadd.f32 %v1029_v37, %v482_v59 }
  0xf1   : > { %v505_v60 = vmax.f32 %v443_v57, 0.0  ;;  %v1159_v61 = vpop.f32.mrb[6].mxu0  ;;  %v514_v19 = vmax.f32 %v488_v17, 0.0 }
  0xf2   : > { %v458_v0 = vadd.f32 %v1159_v61, %v1029_v37  ;;  %v452_v1 = vpop.f32.mrb[7].mxu0  ;;  %v1171_v3 = vpop.f32.mrb[6].mxu1  ;;  %v513_v14 = vmax.f32 %v483_v11, 0.0 }
  0xf3   : > { %v453_v2 = vadd.f32 %v1029_v37, %v452_v1  ;;  %1194 = vmatprep.mubr.msk.f32.mxu1 %vm532_vm1, %v505_v60  ;;  %v492_v4 = vpop.f32.mrb[7].mxu1  ;;  %v498_v20 = vadd.f32 %v1171_v3, %v1029_v37 }
  0xf4   : > { %1195 = vmatmul.mubr.msk.f32.gmra.mrb[12].mxu1 %vm532_vm1, %v506_v63  ;;  %v508_v8 = vmax.f32 %v458_v0, 0.0  ;;  %v493_v15 = vadd.f32 %v1029_v37, %v492_v4 }
  0xf5   : > { %v507_v5 = vmax.f32 %v453_v2, 0.0  ;;  %v516_v21 = vmax.f32 %v498_v20, 0.0 }
  0xf6   : > { %v515_v18 = vmax.f32 %v493_v15, 0.0 }
  0xf7   : > { %1197 = vmatprep.mubr.msk.f32.mxu1 %vm532_vm1, %v507_v5 }
  0xf8   : > { %1198 = vmatmul.mubr.msk.f32.gmra.mrb[14].mxu1 %vm532_vm1, %v508_v8 }
  0xf9   : > { %1200 = vmatprep.mubr.msk.f32.mxu1 %vm532_vm1, %v509_v6 }
  0xfc   : > { %1201 = vmatmul.mubr.msk.f32.gmra.mrb[16].mxu1 %vm532_vm1, %v510_v12 }
  0xfd   : > { %1203 = vmatprep.mubr.msk.f32.mxu1 %vm532_vm1, %v511_v10 }
 0x100   : > { %1204 = vmatmul.mubr.msk.f32.gmra.mrb[18].mxu1 %vm532_vm1, %v512_v16 }
 0x101   : > { %1206 = vmatprep.mubr.msk.f32.mxu1 %vm532_vm1, %v513_v14 }
 0x104   : > { %1207 = vmatmul.mubr.msk.f32.gmra.mrb[20].mxu1 %vm532_vm1, %v514_v19 }
 0x105   : > { %1209 = vmatprep.mubr.msk.f32.mxu1 %vm532_vm1, %v515_v18 }
 0x108   : > { %1210 = vmatmul.mubr.msk.f32.gmra.mrb[22].mxu1 %vm532_vm1, %v516_v21 }
 0x1bf   : > { %v1190_v23 = vpop.f32.mrb[8].mxu1 }
 0x1c0   : > { %v653_v24 = vadd.f32 %v1190_v23, %v1046_v22  ;;  %v647_v25 = vpop.f32.mrb[9].mxu1 }
 0x1c1   : > { %v648_v26 = vadd.f32 %v1046_v22, %v647_v25 }
 0x1c2   : > { %v727_v29 = vmax.f32 %v653_v24, 0.0 }
 0x1c3   : > { %v726_v27 = vmax.f32 %v648_v26, 0.0  ;;  %v1193_v28 = vpop.f32.mrb[10].mxu1 }
 0x1c4   : > { %v663_v30 = vadd.f32 %v1193_v28, %v1046_v22  ;;  %v657_v31 = vpop.f32.mrb[11].mxu1 }
 0x1c5   : > { %v658_v32 = vadd.f32 %v1046_v22, %v657_v31  ;;  %1220 = vmatprep.mubr.msk.f32.mxu0 %vm753_vm2, %v726_v27 }
 0x1c6   : > { %1221 = vmatmul.mubr.msk.f32.vlgmr.msra.gmra.mrb[8].mxu0 %vm753_vm2, %v727_v29  ;;  %v729_v35 = vmax.f32 %v663_v30, 0.0 }
 0x1c7   : > { %v728_v33 = vmax.f32 %v658_v32, 0.0  ;;  %v1196_v34 = vpop.f32.mrb[12].mxu1 }
 0x1c8   : > { %v673_v36 = vadd.f32 %v1196_v34, %v1046_v22  ;;  %v667_v37 = vpop.f32.mrb[13].mxu1 }
 0x1c9   : > { %v668_v38 = vadd.f32 %v1046_v22, %v667_v37  ;;  %1223 = vmatprep.mubr.msk.f32.mxu0 %vm753_vm2, %v728_v33 }
 0x1ca   : > { %1224 = vmatmul.mubr.msk.f32.gmra.mrb[10].mxu0 %vm753_vm2, %v729_v35  ;;  %v731_v41 = vmax.f32 %v673_v36, 0.0 }
 0x1cb   : > { %v730_v39 = vmax.f32 %v668_v38, 0.0  ;;  %v1199_v40 = vpop.f32.mrb[14].mxu1 }
 0x1cc   : > { %v683_v42 = vadd.f32 %v1199_v40, %v1046_v22  ;;  %v677_v43 = vpop.f32.mrb[15].mxu1 }
 0x1cd   : > { %v678_v44 = vadd.f32 %v1046_v22, %v677_v43  ;;  %1226 = vmatprep.mubr.msk.f32.mxu0 %vm753_vm2, %v730_v39 }
 0x1ce   : > { %1227 = vmatmul.mubr.msk.f32.gmra.mrb[12].mxu0 %vm753_vm2, %v731_v41  ;;  %v733_v47 = vmax.f32 %v683_v42, 0.0 }
 0x1cf   : > { %v732_v45 = vmax.f32 %v678_v44, 0.0  ;;  %v1202_v46 = vpop.f32.mrb[16].mxu1 }
 0x1d0   : > { %v693_v48 = vadd.f32 %v1202_v46, %v1046_v22  ;;  %v687_v49 = vpop.f32.mrb[17].mxu1 }
 0x1d1   : > { %v688_v50 = vadd.f32 %v1046_v22, %v687_v49  ;;  %1229 = vmatprep.mubr.msk.f32.mxu0 %vm753_vm2, %v732_v45 }
 0x1d2   : > { %1230 = vmatmul.mubr.msk.f32.gmra.mrb[14].mxu0 %vm753_vm2, %v733_v47  ;;  %v735_v53 = vmax.f32 %v693_v48, 0.0 }
 0x1d3   : > { %v734_v51 = vmax.f32 %v688_v50, 0.0  ;;  %v1205_v52 = vpop.f32.mrb[18].mxu1 }
 0x1d4   : > { %v703_v54 = vadd.f32 %v1205_v52, %v1046_v22  ;;  %v697_v55 = vpop.f32.mrb[19].mxu1 }
 0x1d5   : > { %v698_v56 = vadd.f32 %v1046_v22, %v697_v55  ;;  %1232 = vmatprep.mubr.msk.f32.mxu0 %vm753_vm2, %v734_v51 }
 0x1d6   : > { %1233 = vmatmul.mubr.msk.f32.gmra.mrb[16].mxu0 %vm753_vm2, %v735_v53  ;;  %v737_v59 = vmax.f32 %v703_v54, 0.0 }
 0x1d7   : > { %v736_v57 = vmax.f32 %v698_v56, 0.0  ;;  %v1208_v58 = vpop.f32.mrb[20].mxu1 }
 0x1d8   : > { %v713_v60 = vadd.f32 %v1208_v58, %v1046_v22  ;;  %v707_v61 = vpop.f32.mrb[21].mxu1 }
 0x1d9   : > { %v708_v62 = vadd.f32 %v1046_v22, %v707_v61  ;;  %1235 = vmatprep.mubr.msk.f32.mxu0 %vm753_vm2, %v736_v57 }
 0x1da   : > { %1236 = vmatmul.mubr.msk.f32.gmra.mrb[18].mxu0 %vm753_vm2, %v737_v59  ;;  %v739_v1 = vmax.f32 %v713_v60, 0.0 }
 0x1db   : > { %v738_v63 = vmax.f32 %v708_v62, 0.0  ;;  %v1211_v0 = vpop.f32.mrb[22].mxu1 }
 0x1dc   : > { %v723_v2 = vadd.f32 %v1211_v0, %v1046_v22  ;;  %v717_v3 = vpop.f32.mrb[23].mxu1 }
 0x1dd   : > { %v718_v4 = vadd.f32 %v1046_v22, %v717_v3  ;;  %1238 = vmatprep.mubr.msk.f32.mxu0 %vm753_vm2, %v738_v63 }
 0x1de   : > { %1239 = vmatmul.mubr.msk.f32.gmra.mrb[20].mxu0 %vm753_vm2, %v739_v1  ;;  %v741_v6 = vmax.f32 %v723_v2, 0.0 }
 0x1df   : > { %v740_v5 = vmax.f32 %v718_v4, 0.0 }
 0x1e1   : > { %1241 = vmatprep.mubr.msk.f32.mxu0 %vm753_vm2, %v740_v5 }
 0x1e2   : > { %1242 = vmatmul.mubr.msk.f32.gmra.mrb[22].mxu0 %vm753_vm2, %v741_v6 }
 0x299   : > { %v1222_v8 = vpop.f32.mrb[8].mxu0 }
 0x29a   : > { %v874_v9 = vadd.f32 %v1222_v8, %v1063_v7  ;;  %v868_v10 = vpop.f32.mrb[9].mxu0 }
 0x29b   : > { %v869_v11 = vadd.f32 %v1063_v7, %v868_v10 }
 0x29c   : > { %949 = vst.msk [vmem:[%s1468_s25 + $0x8] sm:$0xff] %vm947_vm3, %v874_v9 }
 0x29d   : > { %948 = vst.msk [vmem:[%s1468_s25] sm:$0xff] %vm947_vm3, %v869_v11  ;;  %v1225_v12 = vpop.f32.mrb[10].mxu0 }
 0x29e   : > { %v884_v13 = vadd.f32 %v1225_v12, %v1063_v7  ;;  %v878_v14 = vpop.f32.mrb[11].mxu0 }
 0x29f   : > { %v879_v15 = vadd.f32 %v1063_v7, %v878_v14 }
 0x2a0   : > { %951 = vst.msk [vmem:[%s1468_s25 + $0x18] sm:$0xff] %vm947_vm3, %v884_v13 }
 0x2a1   : > { %950 = vst.msk [vmem:[%s1468_s25 + $0x10] sm:$0xff] %vm947_vm3, %v879_v15  ;;  %v1228_v16 = vpop.f32.mrb[12].mxu0 }
 0x2a2   : > { %v894_v17 = vadd.f32 %v1228_v16, %v1063_v7  ;;  %v888_v18 = vpop.f32.mrb[13].mxu0 }
 0x2a3   : > { %v889_v19 = vadd.f32 %v1063_v7, %v888_v18 }
 0x2a4   : > { %953 = vst.msk [vmem:[%s1468_s25 + $0x28] sm:$0xff] %vm947_vm3, %v894_v17 }
 0x2a5   : > { %952 = vst.msk [vmem:[%s1468_s25 + $0x20] sm:$0xff] %vm947_vm3, %v889_v19  ;;  %v1231_v20 = vpop.f32.mrb[14].mxu0 }
 0x2a6   : > { %v904_v21 = vadd.f32 %v1231_v20, %v1063_v7  ;;  %v898_v22 = vpop.f32.mrb[15].mxu0 }
 0x2a7   : > { %v899_v23 = vadd.f32 %v1063_v7, %v898_v22 }
 0x2a8   : > { %955 = vst.msk [vmem:[%s1468_s25 + $0x38] sm:$0xff] %vm947_vm3, %v904_v21 }
 0x2a9   : > { %954 = vst.msk [vmem:[%s1468_s25 + $0x30] sm:$0xff] %vm947_vm3, %v899_v23  ;;  %v1234_v24 = vpop.f32.mrb[16].mxu0 }
 0x2aa   : > { %v914_v25 = vadd.f32 %v1234_v24, %v1063_v7  ;;  %v908_v26 = vpop.f32.mrb[17].mxu0 }
 0x2ab   : > { %v909_v27 = vadd.f32 %v1063_v7, %v908_v26 }
 0x2ac   : > { %957 = vst.msk [vmem:[%s1468_s25 + $0x48] sm:$0xff] %vm947_vm3, %v914_v25 }
 0x2ad   : > { %956 = vst.msk [vmem:[%s1468_s25 + $0x40] sm:$0xff] %vm947_vm3, %v909_v27  ;;  %v1237_v28 = vpop.f32.mrb[18].mxu0 }
 0x2ae   : > { %v924_v29 = vadd.f32 %v1237_v28, %v1063_v7  ;;  %v918_v30 = vpop.f32.mrb[19].mxu0 }
 0x2af   : > { %v919_v31 = vadd.f32 %v1063_v7, %v918_v30 }
 0x2b0   : > { %959 = vst.msk [vmem:[%s1468_s25 + $0x58] sm:$0xff] %vm947_vm3, %v924_v29 }
 0x2b1   : > { %958 = vst.msk [vmem:[%s1468_s25 + $0x50] sm:$0xff] %vm947_vm3, %v919_v31  ;;  %v1240_v32 = vpop.f32.mrb[20].mxu0 }
 0x2b2   : > { %v934_v33 = vadd.f32 %v1240_v32, %v1063_v7  ;;  %v928_v34 = vpop.f32.mrb[21].mxu0 }
 0x2b3   : > { %v929_v35 = vadd.f32 %v1063_v7, %v928_v34 }
 0x2b4   : > { %961 = vst.msk [vmem:[%s1468_s25 + $0x68] sm:$0xff] %vm947_vm3, %v934_v33 }
 0x2b5   : > { %960 = vst.msk [vmem:[%s1468_s25 + $0x60] sm:$0xff] %vm947_vm3, %v929_v35  ;;  %v1243_v36 = vpop.f32.mrb[22].mxu0 }
 0x2b6   : > { %v944_v37 = vadd.f32 %v1243_v36, %v1063_v7  ;;  %v938_v38 = vpop.f32.mrb[23].mxu0 }
 0x2b7   : > { %v939_v39 = vadd.f32 %v1063_v7, %v938_v38 }
 0x2b8   : > { %963 = vst.msk [vmem:[%s1468_s25 + $0x78] sm:$0xff] %vm947_vm3, %v944_v37 }
 0x2b9   : > { %962 = vst.msk [vmem:[%s1468_s25 + $0x70] sm:$0xff] %vm947_vm3, %v939_v39 }
 0x2ba PF: > { %s17_s24 = sadd.s32 1, %s1288_s24  }
 0x2bb   : > { %p14_p4 = scmp.ge.s32.totalorder %s17_s24, 4  }
 0x2bd   :  { %16 = sbr.rel (!%p14_p4) target bundleno = 1 (0x1), region = 78 }

</bundles_post_ra>
